<compile_context>
chip_gen: v7x
topology: tpu7x:2x2x1
jax: 0.10.0
libtpu: 0.0.40
codegen_flags: <defaults>
</compile_context>

<pallas_src>
import functools

import jax
import jax.numpy as jnp
from jax.experimental import pallas as pl
from jax.experimental.pallas import tpu as pltpu

# ---- small synthetic config (analogues of CAM_NUM / HEIGHT / WIDTH / classes) ----
CAM_NUM = 2
HEIGHT = 16
WIDTH = 16
NUM_CLASSES = 8
HIDDEN = 16
BATCH = 2

HW = HEIGHT * WIDTH

# parameter-slab layout -- every block starts at a multiple-of-8 row offset
_K_CONV = 80                                    # 9 taps * 8 rows + 8-row bias block
_K_HID = 24                                     # 16 hidden + 1 bias-passthrough + 7 pad
_K_MRG = 32                                     # 16 soft-label + 8 pointcloud + 8 bias block
_PC_ROWS = CAM_NUM * 4 + 8                      # pc channels + ones row + zero pad = 16
_SLAB_ROWS = 48                                 # 24 (w1) + 8 (w2) + 16 (merger)


# ------------------------------ fused kernel ----------------------------------

def _make_kernel(bt):
    """Build the fused kernel for a batch tile of `bt` images per grid step."""
    cam, W = CAM_NUM, WIDTH
    lc = bt * cam * HW            # conv-stage lane width (images side by side)
    # merger-stage lane width is bt*HW (per-pixel lanes, cams on sublanes)

    def kernel(img_ref, pc_ref, slab_ref, single_ref, multi_ref, col_ref):
        # img_ref:    (1, 8, lc)     channels 0..2 = RGB, 3..7 = zero pad
        # pc_ref:     (1, 16, lm)    rows 0..7 = CAM*4 pc channels, row 8 = ones, 9..15 = 0
        # slab_ref:   (48, 128)      packed parameters (see pack_param_slab)
        # single_ref: (1, 16, lm)    CAM*C single-view soft labels
        # multi_ref:  (1, 16, lm)    CAM*C multi-view soft labels
        # col_ref:    (80, lc)       im2col scratch, one aligned 8-row block per tap
        x8 = img_ref[0]                                              # (8, lc) f32

        lane = jax.lax.broadcasted_iota(jnp.int32, (1, lc), 1)
        pix = lane % HW            # pixel index within its own image
        colw = lane % W            # column index within its own image

        # --- aligned im2col: one 8-row block per 3x3 tap ---------------------
        tap = 0
        for dy in (-1, 0, 1):
            for dx in (-1, 0, 1):
                if dy == 0 and dx == 0:
                    shifted = x8
                else:
                    s = dy * W + dx
                    rolled = pltpu.roll(x8, shift=(-s) % lc, axis=1)
                    valid = ((pix + s >= 0) & (pix + s < HW) &
                             (colw + dx >= 0) & (colw + dx < W))
                    shifted = jnp.where(valid, rolled, 0.0)
                col_ref[8 * tap:8 * tap + 8, :] = shifted
                tap += 1
        # bias block: row 72 = ones (feeds the folded b1 / bias-passthrough row)
        sub = jax.lax.broadcasted_iota(jnp.int32, (8, lc), 0)
        col_ref[72:80, :] = jnp.where(sub == 0, 1.0, 0.0)

        # --- static views into the packed parameter slab ---------------------
        w1 = slab_ref[0:24, 0:_K_CONV]         # (24, 80)  rows 0..15 conv, row 16 bias row
        w2 = slab_ref[24:32, 0:_K_HID]         # (8, 24)   col 16 = b2
        wm = slab_ref[32:48, 0:_K_MRG]         # (16, 32)  [wm_sl + I | wm_pc | bm | 0]

        # --- DeepLab surrogate: 3x3 conv (single K=80 matmul) + ReLU, 1x1 head
        hidden = jnp.maximum(
            jnp.dot(w1, col_ref[...], preferred_element_type=jnp.float32), 0.0)
        logits = jnp.dot(w2, hidden, preferred_element_type=jnp.float32)   # (8, lc)

        # --- restack (C, bt*CAM*HW) -> (CAM*C, bt*HW): cams onto sublanes ----
        # all lane slices are 256-aligned, all sublane blocks are 8 rows.
        blocks = []
        for cm in range(cam):
            per_img = [logits[:, (j * cam + cm) * HW:(j * cam + cm + 1) * HW]
                       for j in range(bt)]
            blocks.append(per_img[0] if bt == 1 else jnp.concatenate(per_img, axis=1))
        sl = jnp.concatenate(blocks, axis=0)                                # (16, lm)
        single_ref[0] = sl

        # --- merger surrogate: ONE fused cross-view matmul -------------------
        # [wm_sl + I | wm_pc | bm] @ [soft_labels ; pointcloud ; ones-block]
        mstack = jnp.concatenate([sl, pc_ref[0]], axis=0)                   # (32, lm)
        multi_ref[0] = jnp.dot(wm, mstack, preferred_element_type=jnp.float32)

    return kernel


def _pick_batch_tile(batch):
    """Collapse the grid on single-TC chips; keep >=2 parallel steps otherwise."""
    try:
        kind = jax.devices()[0].device_kind.lower()
    except Exception:  # pragma: no cover
        kind = ""
    single_tc = any(t in kind for t in ("v5e", "v5 lite", "v5lite",
                                        "v6e", "v6 lite", "v6lite"))
    bt = batch if single_tc else max(1, batch // 2)
    while batch % bt:           # keep the grid exact
        bt -= 1
    return bt


# ----------------------------- parameters --------------------------------------

def init_params(key):
    k1, k2, k3, k4, k5, k6, k7 = jax.random.split(key, 7)
    C = NUM_CLASSES
    return {
        # conv weight laid out (Cout, ky, kx, Cin) to match the tap-major im2col
        "w1": 0.1 * jax.random.normal(k1, (HIDDEN, 3, 3, 3), jnp.float32),
        "b1": 0.1 * jax.random.normal(k2, (HIDDEN,), jnp.float32),
        "w2": 0.1 * jax.random.normal(k3, (C, HIDDEN), jnp.float32),
        "b2": 0.1 * jax.random.normal(k4, (C,), jnp.float32),
        "wm_sl": 0.1 * jax.random.normal(k5, (CAM_NUM * C, CAM_NUM * C), jnp.float32),
        "wm_pc": 0.1 * jax.random.normal(k6, (CAM_NUM * C, CAM_NUM * 4), jnp.float32),
        "bm": 0.1 * jax.random.normal(k7, (CAM_NUM * C,), jnp.float32),
    }


def pack_param_slab(p):
    """Pack all weights/biases (with bias + residual folds) into one (48,128) slab."""
    C = NUM_CLASSES
    # w1 block (rows 0..23): col 8*tap + cin = conv weight, col 72 = b1,
    # row HIDDEN (=16) is the bias-passthrough row (1.0 at col 72).
    w1_taps = jnp.pad(p["w1"].reshape(HIDDEN, 9, 3), ((0, 0), (0, 0), (0, 5)))
    w1_blk = jnp.zeros((_K_HID, _K_CONV), jnp.float32)
    w1_blk = w1_blk.at[:HIDDEN, :72].set(w1_taps.reshape(HIDDEN, 72))
    w1_blk = w1_blk.at[:HIDDEN, 72].set(p["b1"])
    w1_blk = w1_blk.at[HIDDEN, 72].set(1.0)
    # w2 block (rows 24..31): col 16 = b2 (multiplies the hidden ones row)
    w2_blk = jnp.zeros((C, _K_HID), jnp.float32)
    w2_blk = w2_blk.at[:, :HIDDEN].set(p["w2"])
    w2_blk = w2_blk.at[:, HIDDEN].set(p["b2"])
    # merger block (rows 32..47): [wm_sl + I | wm_pc | bm | 0]
    wm_blk = jnp.zeros((CAM_NUM * C, _K_MRG), jnp.float32)
    wm_blk = wm_blk.at[:, :CAM_NUM * C].set(
        p["wm_sl"] + jnp.eye(CAM_NUM * C, dtype=jnp.float32))
    wm_blk = wm_blk.at[:, CAM_NUM * C:CAM_NUM * C + CAM_NUM * 4].set(p["wm_pc"])
    wm_blk = wm_blk.at[:, CAM_NUM * C + CAM_NUM * 4].set(p["bm"])

    slab = jnp.zeros((_SLAB_ROWS, 128), jnp.float32)
    slab = slab.at[0:24, 0:_K_CONV].set(w1_blk)
    slab = slab.at[24:32, 0:_K_HID].set(w2_blk)
    slab = slab.at[32:48, 0:_K_MRG].set(wm_blk)
    return slab


# ----------------------------- model forward ----------------------------------

@functools.partial(jax.jit, static_argnames=("batch_tile",))
def deeplab_multiview_forward(slab, image, pointcloud, label, *, batch_tile=1):
    """
    image:      (B, CAM_NUM, 3, H, W)  float32
    pointcloud: (B, CAM_NUM, 4, H, W)  float32
    label:      (B, CAM_NUM, H, W)     int32
    returns (soft_label_singleview, soft_label_multiview, label)
      both soft labels: (B, CAM_NUM, NUM_CLASSES, H, W)
    """
    B, cam, _, H, W = image.shape
    C = NUM_CLASSES
    bt = batch_tile
    assert B % bt == 0
    G = B // bt
    lc = bt * cam * HW
    lm = bt * HW

    # lane-dense kernel layouts (cheap XLA reshuffles/pads of tiny arrays)
    img = image.reshape(G, bt, cam, 3, HW).transpose(0, 3, 1, 2, 4).reshape(G, 3, lc)
    img8 = jnp.pad(img, ((0, 0), (0, 5), (0, 0)))                 # channels 3 -> 8
    pc = (pointcloud.reshape(G, bt, cam * 4, HW)
          .transpose(0, 2, 1, 3).reshape(G, cam * 4, lm))
    pc16 = jnp.concatenate([pc, jnp.ones((G, 1, lm), jnp.float32),
                            jnp.zeros((G, 7, lm), jnp.float32)], axis=1)

    single_flat, multi_flat = pl.pallas_call(
        _make_kernel(bt),
        out_shape=(jax.ShapeDtypeStruct((G, cam * C, lm), jnp.float32),
                   jax.ShapeDtypeStruct((G, cam * C, lm), jnp.float32)),
        grid=(G,),
        in_specs=[
            pl.BlockSpec((1, 8, lc), lambda g: (g, 0, 0)),
            pl.BlockSpec((1, _PC_ROWS, lm), lambda g: (g, 0, 0)),
            pl.BlockSpec((_SLAB_ROWS, 128), lambda g: (0, 0)),
        ],
        out_specs=(pl.BlockSpec((1, cam * C, lm), lambda g: (g, 0, 0)),
                   pl.BlockSpec((1, cam * C, lm), lambda g: (g, 0, 0))),
        scratch_shapes=[pltpu.VMEM((_K_CONV, lc), jnp.float32)],
        compiler_params=pltpu.CompilerParams(dimension_semantics=("parallel",)),
    )(img8, pc16, slab)

    def unpack(flat):   # (G, CAM*C, bt*HW) -> (B, CAM, C, H, W)
        return (flat.reshape(G, cam, C, bt, HW)
                .transpose(0, 3, 1, 2, 4)
                .reshape(B, cam, C, H, W))

    return unpack(single_flat), unpack(multi_flat), label


# ----------------------------- pure-JAX reference -------------------------------

def reference_forward(p, image, pointcloud, label):
    """Pure-JAX reference of the same synthetic surrogate forward pass."""
    B, cam, _, H, W = image.shape
    C = NUM_CLASSES
    hi = jax.lax.Precision.HIGHEST
    x = image.reshape(B * cam, 3, H, W)
    w_oihw = p["w1"].transpose(0, 3, 1, 2)             # (Cout, Cin, kh, kw)
    h = jax.lax.conv_general_dilated(
        x, w_oihw, window_strides=(1, 1), padding="SAME",
        dimension_numbers=("NCHW", "OIHW", "NCHW"), precision=hi)
    h = jax.nn.relu(h + p["b1"][None, :, None, None])
    logits = (jnp.einsum("oc,bchw->bohw", p["w2"], h, precision=hi)
              + p["b2"][None, :, None, None])
    single = logits.reshape(B, cam, C, H, W)
    sl = single.reshape(B, cam * C, H * W)
    pc = pointcloud.reshape(B, cam * 4, H * W)
    fused = (jnp.einsum("ij,bjp->bip", p["wm_sl"], sl, precision=hi)
             + jnp.einsum("ij,bjp->bip", p["wm_pc"], pc, precision=hi)
             + p["bm"][None, :, None] + sl)
    return single, fused.reshape(B, cam, C, H, W), label


# ----------------------------------- main --------------------------------------

if __name__ == "__main__":
    key = jax.random.PRNGKey(0)
    kp, ki, kc, kl = jax.random.split(key, 4)

    params = init_params(kp)
    slab = pack_param_slab(params)
    image = jax.random.normal(ki, (BATCH, CAM_NUM, 3, HEIGHT, WIDTH), jnp.float32)
    pointcloud = jax.random.normal(kc, (BATCH, CAM_NUM, 4, HEIGHT, WIDTH), jnp.float32)
    label = jax.random.randint(kl, (BATCH, CAM_NUM, HEIGHT, WIDTH), 0, NUM_CLASSES
                               ).astype(jnp.int32)

    bt = _pick_batch_tile(BATCH)
    single, multi, label_out = deeplab_multiview_forward(
        slab, image, pointcloud, label, batch_tile=bt)
    jax.block_until_ready((single, multi, label_out))

    assert single.shape == (BATCH, CAM_NUM, NUM_CLASSES, HEIGHT, WIDTH)
    assert multi.shape == (BATCH, CAM_NUM, NUM_CLASSES, HEIGHT, WIDTH)
    assert label_out.shape == (BATCH, CAM_NUM, HEIGHT, WIDTH)

    ref_single, ref_multi, _ = reference_forward(params, image, pointcloud, label)
    assert jnp.allclose(single, ref_single, atol=1e-2, rtol=1e-2), (
        "single-view mismatch, max|d|=%g" % float(jnp.max(jnp.abs(single - ref_single))))
    assert jnp.allclose(multi, ref_multi, atol=1e-2, rtol=1e-2), (
        "multi-view mismatch, max|d|=%g" % float(jnp.max(jnp.abs(multi - ref_multi))))
    print("KERNEL_OK")
</pallas_src>

<mosaic_0001>
module attributes {stable_mosaic.version = 11 : i64} {
  func.func @kernel(%arg0: i32, %arg1: memref<1x8x512xf32, #tpu.memory_space<vmem>>, %arg2: memref<1x16x256xf32, #tpu.memory_space<vmem>>, %arg3: memref<48x128xf32, #tpu.memory_space<vmem>>, %arg4: memref<1x16x256xf32, #tpu.memory_space<vmem>>, %arg5: memref<1x16x256xf32, #tpu.memory_space<vmem>>, %arg6: memref<80x512xf32, #tpu.memory_space<vmem>>) attributes {dimension_semantics = [#tpu.dimension_semantics<parallel>], iteration_bounds = array<i64: 2>, scalar_prefetch = 0 : i64, scratch_operands = 1 : i64, tpu.core_type = #tpu.core_type<tc>, window_params = [{transform_indices = @transform_0, window_bounds = array<i64: 1, 8, 512>}, {transform_indices = @transform_1, window_bounds = array<i64: 1, 16, 256>}, {pipeline_mode = #tpu.pipeline_mode<synchronous>, transform_indices = @transform_2, window_bounds = array<i64: 48, 128>}, {transform_indices = @transform_3, window_bounds = array<i64: 1, 16, 256>}, {transform_indices = @transform_4, window_bounds = array<i64: 1, 16, 256>}]} {
    %c0 = arith.constant 0 : index
    %c0_0 = arith.constant 0 : index
    %c0_1 = arith.constant 0 : index
    %0 = vector.load %arg1[%c0, %c0_0, %c0_1] : memref<1x8x512xf32, #tpu.memory_space<vmem>>, vector<1x8x512xf32>
    %1 = vector.shape_cast %0 : vector<1x8x512xf32> to vector<8x512xf32>
    %2 = tpu.iota {dimensions = array<i32: 1>} : vector<1x512xi32>
    %c256_i32 = arith.constant 256 : i32
    %c0_i32 = arith.constant 0 : i32
    %3 = arith.cmpi eq, %c256_i32, %c0_i32 : i32
    %c1_i32 = arith.constant 1 : i32
    %4 = arith.select %3, %c1_i32, %c256_i32 : i32
    %5 = vector.broadcast %4 : i32 to vector<1x512xi32>
    %6 = arith.remsi %2, %5 : vector<1x512xi32>
    %c0_i32_2 = arith.constant 0 : i32
    %7 = vector.broadcast %c0_i32_2 : i32 to vector<1x512xi32>
    %8 = arith.cmpi ne, %6, %7 : vector<1x512xi32>
    %c0_i32_3 = arith.constant 0 : i32
    %9 = vector.broadcast %c0_i32_3 : i32 to vector<1x512xi32>
    %10 = arith.cmpi slt, %6, %9 : vector<1x512xi32>
    %c0_i32_4 = arith.constant 0 : i32
    %11 = arith.cmpi slt, %4, %c0_i32_4 : i32
    %12 = vector.broadcast %11 : i1 to vector<1x512xi1>
    %13 = vector.broadcast %12 : vector<1x512xi1> to vector<1x512xi1>
    %14 = arith.xori %10, %13 : vector<1x512xi1>
    %15 = arith.andi %14, %8 : vector<1x512xi1>
    %16 = vector.broadcast %4 : i32 to vector<1x512xi32>
    %17 = arith.addi %6, %16 : vector<1x512xi32>
    %18 = arith.select %15, %17, %6 : vector<1x512xi1>, vector<1x512xi32>
    %c16_i32 = arith.constant 16 : i32
    %c0_i32_5 = arith.constant 0 : i32
    %19 = arith.cmpi eq, %c16_i32, %c0_i32_5 : i32
    %c1_i32_6 = arith.constant 1 : i32
    %20 = arith.select %19, %c1_i32_6, %c16_i32 : i32
    %21 = vector.broadcast %20 : i32 to vector<1x512xi32>
    %22 = arith.remsi %2, %21 : vector<1x512xi32>
    %c0_i32_7 = arith.constant 0 : i32
    %23 = vector.broadcast %c0_i32_7 : i32 to vector<1x512xi32>
    %24 = arith.cmpi ne, %22, %23 : vector<1x512xi32>
    %c0_i32_8 = arith.constant 0 : i32
    %25 = vector.broadcast %c0_i32_8 : i32 to vector<1x512xi32>
    %26 = arith.cmpi slt, %22, %25 : vector<1x512xi32>
    %c0_i32_9 = arith.constant 0 : i32
    %27 = arith.cmpi slt, %20, %c0_i32_9 : i32
    %28 = vector.broadcast %27 : i1 to vector<1x512xi1>
    %29 = vector.broadcast %28 : vector<1x512xi1> to vector<1x512xi1>
    %30 = arith.xori %26, %29 : vector<1x512xi1>
    %31 = arith.andi %30, %24 : vector<1x512xi1>
    %32 = vector.broadcast %20 : i32 to vector<1x512xi32>
    %33 = arith.addi %22, %32 : vector<1x512xi32>
    %34 = arith.select %31, %33, %22 : vector<1x512xi1>, vector<1x512xi32>
    %c17_i32 = arith.constant 17 : i32
    %35 = tpu.dynamic_rotate %1 by %c17_i32 dim 1 : vector<8x512xf32>, i32 -> vector<8x512xf32>
    %c-17_i32 = arith.constant -17 : i32
    %36 = vector.broadcast %c-17_i32 : i32 to vector<1x512xi32>
    %37 = arith.addi %18, %36 : vector<1x512xi32>
    %c0_i32_10 = arith.constant 0 : i32
    %38 = vector.broadcast %c0_i32_10 : i32 to vector<1x512xi32>
    %39 = arith.cmpi sge, %37, %38 : vector<1x512xi32>
    %c-17_i32_11 = arith.constant -17 : i32
    %40 = vector.broadcast %c-17_i32_11 : i32 to vector<1x512xi32>
    %41 = arith.addi %18, %40 : vector<1x512xi32>
    %c256_i32_12 = arith.constant 256 : i32
    %42 = vector.broadcast %c256_i32_12 : i32 to vector<1x512xi32>
    %43 = arith.cmpi slt, %41, %42 : vector<1x512xi32>
    %44 = arith.andi %39, %43 : vector<1x512xi1>
    %c-1_i32 = arith.constant -1 : i32
    %45 = vector.broadcast %c-1_i32 : i32 to vector<1x512xi32>
    %46 = arith.addi %34, %45 : vector<1x512xi32>
    %c0_i32_13 = arith.constant 0 : i32
    %47 = vector.broadcast %c0_i32_13 : i32 to vector<1x512xi32>
    %48 = arith.cmpi sge, %46, %47 : vector<1x512xi32>
    %49 = arith.andi %44, %48 : vector<1x512xi1>
    %c-1_i32_14 = arith.constant -1 : i32
    %50 = vector.broadcast %c-1_i32_14 : i32 to vector<1x512xi32>
    %51 = arith.addi %34, %50 : vector<1x512xi32>
    %c16_i32_15 = arith.constant 16 : i32
    %52 = vector.broadcast %c16_i32_15 : i32 to vector<1x512xi32>
    %53 = arith.cmpi slt, %51, %52 : vector<1x512xi32>
    %54 = arith.andi %49, %53 : vector<1x512xi1>
    %cst = arith.constant 0.000000e+00 : f32
    %55 = vector.shape_cast %54 : vector<1x512xi1> to vector<1x512xi1>
    %56 = vector.broadcast %55 : vector<1x512xi1> to vector<8x512xi1>
    %57 = vector.broadcast %cst : f32 to vector<8x512xf32>
    %58 = arith.select %56, %35, %57 : vector<8x512xi1>, vector<8x512xf32>
    %c0_16 = arith.constant 0 : index
    %c0_17 = arith.constant 0 : index
    %59 = vector.load %arg6[%c0_16, %c0_17] : memref<80x512xf32, #tpu.memory_space<vmem>>, vector<8x512xf32>
    tpu.vector_store %arg6[%c0_16, %c0_17], %58 {strides = array<i32>} : memref<80x512xf32, #tpu.memory_space<vmem>>, vector<8x512xf32>,
    %c16_i32_18 = arith.constant 16 : i32
    %60 = tpu.dynamic_rotate %1 by %c16_i32_18 dim 1 : vector<8x512xf32>, i32 -> vector<8x512xf32>
    %c-16_i32 = arith.constant -16 : i32
    %61 = vector.broadcast %c-16_i32 : i32 to vector<1x512xi32>
    %62 = arith.addi %18, %61 : vector<1x512xi32>
    %c0_i32_19 = arith.constant 0 : i32
    %63 = vector.broadcast %c0_i32_19 : i32 to vector<1x512xi32>
    %64 = arith.cmpi sge, %62, %63 : vector<1x512xi32>
    %c-16_i32_20 = arith.constant -16 : i32
    %65 = vector.broadcast %c-16_i32_20 : i32 to vector<1x512xi32>
    %66 = arith.addi %18, %65 : vector<1x512xi32>
    %c256_i32_21 = arith.constant 256 : i32
    %67 = vector.broadcast %c256_i32_21 : i32 to vector<1x512xi32>
    %68 = arith.cmpi slt, %66, %67 : vector<1x512xi32>
    %69 = arith.andi %64, %68 : vector<1x512xi1>
    %c0_i32_22 = arith.constant 0 : i32
    %70 = vector.broadcast %c0_i32_22 : i32 to vector<1x512xi32>
    %71 = arith.addi %34, %70 : vector<1x512xi32>
    %c0_i32_23 = arith.constant 0 : i32
    %72 = vector.broadcast %c0_i32_23 : i32 to vector<1x512xi32>
    %73 = arith.cmpi sge, %71, %72 : vector<1x512xi32>
    %74 = arith.andi %69, %73 : vector<1x512xi1>
    %c0_i32_24 = arith.constant 0 : i32
    %75 = vector.broadcast %c0_i32_24 : i32 to vector<1x512xi32>
    %76 = arith.addi %34, %75 : vector<1x512xi32>
    %c16_i32_25 = arith.constant 16 : i32
    %77 = vector.broadcast %c16_i32_25 : i32 to vector<1x512xi32>
    %78 = arith.cmpi slt, %76, %77 : vector<1x512xi32>
    %79 = arith.andi %74, %78 : vector<1x512xi1>
    %cst_26 = arith.constant 0.000000e+00 : f32
    %80 = vector.shape_cast %79 : vector<1x512xi1> to vector<1x512xi1>
    %81 = vector.broadcast %80 : vector<1x512xi1> to vector<8x512xi1>
    %82 = vector.broadcast %cst_26 : f32 to vector<8x512xf32>
    %83 = arith.select %81, %60, %82 : vector<8x512xi1>, vector<8x512xf32>
    %c8 = arith.constant 8 : index
    %c0_27 = arith.constant 0 : index
    %84 = vector.load %arg6[%c8, %c0_27] : memref<80x512xf32, #tpu.memory_space<vmem>>, vector<8x512xf32>
    tpu.vector_store %arg6[%c8, %c0_27], %83 {strides = array<i32>} : memref<80x512xf32, #tpu.memory_space<vmem>>, vector<8x512xf32>,
    %c15_i32 = arith.constant 15 : i32
    %85 = tpu.dynamic_rotate %1 by %c15_i32 dim 1 : vector<8x512xf32>, i32 -> vector<8x512xf32>
    %c-15_i32 = arith.constant -15 : i32
    %86 = vector.broadcast %c-15_i32 : i32 to vector<1x512xi32>
    %87 = arith.addi %18, %86 : vector<1x512xi32>
    %c0_i32_28 = arith.constant 0 : i32
    %88 = vector.broadcast %c0_i32_28 : i32 to vector<1x512xi32>
    %89 = arith.cmpi sge, %87, %88 : vector<1x512xi32>
    %c-15_i32_29 = arith.constant -15 : i32
    %90 = vector.broadcast %c-15_i32_29 : i32 to vector<1x512xi32>
    %91 = arith.addi %18, %90 : vector<1x512xi32>
    %c256_i32_30 = arith.constant 256 : i32
    %92 = vector.broadcast %c256_i32_30 : i32 to vector<1x512xi32>
    %93 = arith.cmpi slt, %91, %92 : vector<1x512xi32>
    %94 = arith.andi %89, %93 : vector<1x512xi1>
    %c1_i32_31 = arith.constant 1 : i32
    %95 = vector.broadcast %c1_i32_31 : i32 to vector<1x512xi32>
    %96 = arith.addi %34, %95 : vector<1x512xi32>
    %c0_i32_32 = arith.constant 0 : i32
    %97 = vector.broadcast %c0_i32_32 : i32 to vector<1x512xi32>
    %98 = arith.cmpi sge, %96, %97 : vector<1x512xi32>
    %99 = arith.andi %94, %98 : vector<1x512xi1>
    %c1_i32_33 = arith.constant 1 : i32
    %100 = vector.broadcast %c1_i32_33 : i32 to vector<1x512xi32>
    %101 = arith.addi %34, %100 : vector<1x512xi32>
    %c16_i32_34 = arith.constant 16 : i32
    %102 = vector.broadcast %c16_i32_34 : i32 to vector<1x512xi32>
    %103 = arith.cmpi slt, %101, %102 : vector<1x512xi32>
    %104 = arith.andi %99, %103 : vector<1x512xi1>
    %cst_35 = arith.constant 0.000000e+00 : f32
    %105 = vector.shape_cast %104 : vector<1x512xi1> to vector<1x512xi1>
    %106 = vector.broadcast %105 : vector<1x512xi1> to vector<8x512xi1>
    %107 = vector.broadcast %cst_35 : f32 to vector<8x512xf32>
    %108 = arith.select %106, %85, %107 : vector<8x512xi1>, vector<8x512xf32>
    %c16 = arith.constant 16 : index
    %c0_36 = arith.constant 0 : index
    %109 = vector.load %arg6[%c16, %c0_36] : memref<80x512xf32, #tpu.memory_space<vmem>>, vector<8x512xf32>
    tpu.vector_store %arg6[%c16, %c0_36], %108 {strides = array<i32>} : memref<80x512xf32, #tpu.memory_space<vmem>>, vector<8x512xf32>,
    %c1_i32_37 = arith.constant 1 : i32
    %110 = tpu.dynamic_rotate %1 by %c1_i32_37 dim 1 : vector<8x512xf32>, i32 -> vector<8x512xf32>
    %c-1_i32_38 = arith.constant -1 : i32
    %111 = vector.broadcast %c-1_i32_38 : i32 to vector<1x512xi32>
    %112 = arith.addi %18, %111 : vector<1x512xi32>
    %c0_i32_39 = arith.constant 0 : i32
    %113 = vector.broadcast %c0_i32_39 : i32 to vector<1x512xi32>
    %114 = arith.cmpi sge, %112, %113 : vector<1x512xi32>
    %c-1_i32_40 = arith.constant -1 : i32
    %115 = vector.broadcast %c-1_i32_40 : i32 to vector<1x512xi32>
    %116 = arith.addi %18, %115 : vector<1x512xi32>
    %c256_i32_41 = arith.constant 256 : i32
    %117 = vector.broadcast %c256_i32_41 : i32 to vector<1x512xi32>
    %118 = arith.cmpi slt, %116, %117 : vector<1x512xi32>
    %119 = arith.andi %114, %118 : vector<1x512xi1>
    %c-1_i32_42 = arith.constant -1 : i32
    %120 = vector.broadcast %c-1_i32_42 : i32 to vector<1x512xi32>
    %121 = arith.addi %34, %120 : vector<1x512xi32>
    %c0_i32_43 = arith.constant 0 : i32
    %122 = vector.broadcast %c0_i32_43 : i32 to vector<1x512xi32>
    %123 = arith.cmpi sge, %121, %122 : vector<1x512xi32>
    %124 = arith.andi %119, %123 : vector<1x512xi1>
    %c-1_i32_44 = arith.constant -1 : i32
    %125 = vector.broadcast %c-1_i32_44 : i32 to vector<1x512xi32>
    %126 = arith.addi %34, %125 : vector<1x512xi32>
    %c16_i32_45 = arith.constant 16 : i32
    %127 = vector.broadcast %c16_i32_45 : i32 to vector<1x512xi32>
    %128 = arith.cmpi slt, %126, %127 : vector<1x512xi32>
    %129 = arith.andi %124, %128 : vector<1x512xi1>
    %cst_46 = arith.constant 0.000000e+00 : f32
    %130 = vector.shape_cast %129 : vector<1x512xi1> to vector<1x512xi1>
    %131 = vector.broadcast %130 : vector<1x512xi1> to vector<8x512xi1>
    %132 = vector.broadcast %cst_46 : f32 to vector<8x512xf32>
    %133 = arith.select %131, %110, %132 : vector<8x512xi1>, vector<8x512xf32>
    %c24 = arith.constant 24 : index
    %c0_47 = arith.constant 0 : index
    %134 = vector.load %arg6[%c24, %c0_47] : memref<80x512xf32, #tpu.memory_space<vmem>>, vector<8x512xf32>
    tpu.vector_store %arg6[%c24, %c0_47], %133 {strides = array<i32>} : memref<80x512xf32, #tpu.memory_space<vmem>>, vector<8x512xf32>,
    %c32 = arith.constant 32 : index
    %c0_48 = arith.constant 0 : index
    %135 = vector.load %arg6[%c32, %c0_48] : memref<80x512xf32, #tpu.memory_space<vmem>>, vector<8x512xf32>
    tpu.vector_store %arg6[%c32, %c0_48], %1 {strides = array<i32>} : memref<80x512xf32, #tpu.memory_space<vmem>>, vector<8x512xf32>,
    %c511_i32 = arith.constant 511 : i32
    %136 = tpu.dynamic_rotate %1 by %c511_i32 dim 1 : vector<8x512xf32>, i32 -> vector<8x512xf32>
    %c1_i32_49 = arith.constant 1 : i32
    %137 = vector.broadcast %c1_i32_49 : i32 to vector<1x512xi32>
    %138 = arith.addi %18, %137 : vector<1x512xi32>
    %c0_i32_50 = arith.constant 0 : i32
    %139 = vector.broadcast %c0_i32_50 : i32 to vector<1x512xi32>
    %140 = arith.cmpi sge, %138, %139 : vector<1x512xi32>
    %c1_i32_51 = arith.constant 1 : i32
    %141 = vector.broadcast %c1_i32_51 : i32 to vector<1x512xi32>
    %142 = arith.addi %18, %141 : vector<1x512xi32>
    %c256_i32_52 = arith.constant 256 : i32
    %143 = vector.broadcast %c256_i32_52 : i32 to vector<1x512xi32>
    %144 = arith.cmpi slt, %142, %143 : vector<1x512xi32>
    %145 = arith.andi %140, %144 : vector<1x512xi1>
    %c1_i32_53 = arith.constant 1 : i32
    %146 = vector.broadcast %c1_i32_53 : i32 to vector<1x512xi32>
    %147 = arith.addi %34, %146 : vector<1x512xi32>
    %c0_i32_54 = arith.constant 0 : i32
    %148 = vector.broadcast %c0_i32_54 : i32 to vector<1x512xi32>
    %149 = arith.cmpi sge, %147, %148 : vector<1x512xi32>
    %150 = arith.andi %145, %149 : vector<1x512xi1>
    %c1_i32_55 = arith.constant 1 : i32
    %151 = vector.broadcast %c1_i32_55 : i32 to vector<1x512xi32>
    %152 = arith.addi %34, %151 : vector<1x512xi32>
    %c16_i32_56 = arith.constant 16 : i32
    %153 = vector.broadcast %c16_i32_56 : i32 to vector<1x512xi32>
    %154 = arith.cmpi slt, %152, %153 : vector<1x512xi32>
    %155 = arith.andi %150, %154 : vector<1x512xi1>
    %cst_57 = arith.constant 0.000000e+00 : f32
    %156 = vector.shape_cast %155 : vector<1x512xi1> to vector<1x512xi1>
    %157 = vector.broadcast %156 : vector<1x512xi1> to vector<8x512xi1>
    %158 = vector.broadcast %cst_57 : f32 to vector<8x512xf32>
    %159 = arith.select %157, %136, %158 : vector<8x512xi1>, vector<8x512xf32>
    %c40 = arith.constant 40 : index
    %c0_58 = arith.constant 0 : index
    %160 = vector.load %arg6[%c40, %c0_58] : memref<80x512xf32, #tpu.memory_space<vmem>>, vector<8x512xf32>
    tpu.vector_store %arg6[%c40, %c0_58], %159 {strides = array<i32>} : memref<80x512xf32, #tpu.memory_space<vmem>>, vector<8x512xf32>,
    %c497_i32 = arith.constant 497 : i32
    %161 = tpu.dynamic_rotate %1 by %c497_i32 dim 1 : vector<8x512xf32>, i32 -> vector<8x512xf32>
    %c15_i32_59 = arith.constant 15 : i32
    %162 = vector.broadcast %c15_i32_59 : i32 to vector<1x512xi32>
    %163 = arith.addi %18, %162 : vector<1x512xi32>
    %c0_i32_60 = arith.constant 0 : i32
    %164 = vector.broadcast %c0_i32_60 : i32 to vector<1x512xi32>
    %165 = arith.cmpi sge, %163, %164 : vector<1x512xi32>
    %c15_i32_61 = arith.constant 15 : i32
    %166 = vector.broadcast %c15_i32_61 : i32 to vector<1x512xi32>
    %167 = arith.addi %18, %166 : vector<1x512xi32>
    %c256_i32_62 = arith.constant 256 : i32
    %168 = vector.broadcast %c256_i32_62 : i32 to vector<1x512xi32>
    %169 = arith.cmpi slt, %167, %168 : vector<1x512xi32>
    %170 = arith.andi %165, %169 : vector<1x512xi1>
    %c-1_i32_63 = arith.constant -1 : i32
    %171 = vector.broadcast %c-1_i32_63 : i32 to vector<1x512xi32>
    %172 = arith.addi %34, %171 : vector<1x512xi32>
    %c0_i32_64 = arith.constant 0 : i32
    %173 = vector.broadcast %c0_i32_64 : i32 to vector<1x512xi32>
    %174 = arith.cmpi sge, %172, %173 : vector<1x512xi32>
    %175 = arith.andi %170, %174 : vector<1x512xi1>
    %c-1_i32_65 = arith.constant -1 : i32
    %176 = vector.broadcast %c-1_i32_65 : i32 to vector<1x512xi32>
    %177 = arith.addi %34, %176 : vector<1x512xi32>
    %c16_i32_66 = arith.constant 16 : i32
    %178 = vector.broadcast %c16_i32_66 : i32 to vector<1x512xi32>
    %179 = arith.cmpi slt, %177, %178 : vector<1x512xi32>
    %180 = arith.andi %175, %179 : vector<1x512xi1>
    %cst_67 = arith.constant 0.000000e+00 : f32
    %181 = vector.shape_cast %180 : vector<1x512xi1> to vector<1x512xi1>
    %182 = vector.broadcast %181 : vector<1x512xi1> to vector<8x512xi1>
    %183 = vector.broadcast %cst_67 : f32 to vector<8x512xf32>
    %184 = arith.select %182, %161, %183 : vector<8x512xi1>, vector<8x512xf32>
    %c48 = arith.constant 48 : index
    %c0_68 = arith.constant 0 : index
    %185 = vector.load %arg6[%c48, %c0_68] : memref<80x512xf32, #tpu.memory_space<vmem>>, vector<8x512xf32>
    tpu.vector_store %arg6[%c48, %c0_68], %184 {strides = array<i32>} : memref<80x512xf32, #tpu.memory_space<vmem>>, vector<8x512xf32>,
    %c496_i32 = arith.constant 496 : i32
    %186 = tpu.dynamic_rotate %1 by %c496_i32 dim 1 : vector<8x512xf32>, i32 -> vector<8x512xf32>
    %c16_i32_69 = arith.constant 16 : i32
    %187 = vector.broadcast %c16_i32_69 : i32 to vector<1x512xi32>
    %188 = arith.addi %18, %187 : vector<1x512xi32>
    %c0_i32_70 = arith.constant 0 : i32
    %189 = vector.broadcast %c0_i32_70 : i32 to vector<1x512xi32>
    %190 = arith.cmpi sge, %188, %189 : vector<1x512xi32>
    %c16_i32_71 = arith.constant 16 : i32
    %191 = vector.broadcast %c16_i32_71 : i32 to vector<1x512xi32>
    %192 = arith.addi %18, %191 : vector<1x512xi32>
    %c256_i32_72 = arith.constant 256 : i32
    %193 = vector.broadcast %c256_i32_72 : i32 to vector<1x512xi32>
    %194 = arith.cmpi slt, %192, %193 : vector<1x512xi32>
    %195 = arith.andi %190, %194 : vector<1x512xi1>
    %c0_i32_73 = arith.constant 0 : i32
    %196 = vector.broadcast %c0_i32_73 : i32 to vector<1x512xi32>
    %197 = arith.addi %34, %196 : vector<1x512xi32>
    %c0_i32_74 = arith.constant 0 : i32
    %198 = vector.broadcast %c0_i32_74 : i32 to vector<1x512xi32>
    %199 = arith.cmpi sge, %197, %198 : vector<1x512xi32>
    %200 = arith.andi %195, %199 : vector<1x512xi1>
    %c0_i32_75 = arith.constant 0 : i32
    %201 = vector.broadcast %c0_i32_75 : i32 to vector<1x512xi32>
    %202 = arith.addi %34, %201 : vector<1x512xi32>
    %c16_i32_76 = arith.constant 16 : i32
    %203 = vector.broadcast %c16_i32_76 : i32 to vector<1x512xi32>
    %204 = arith.cmpi slt, %202, %203 : vector<1x512xi32>
    %205 = arith.andi %200, %204 : vector<1x512xi1>
    %cst_77 = arith.constant 0.000000e+00 : f32
    %206 = vector.shape_cast %205 : vector<1x512xi1> to vector<1x512xi1>
    %207 = vector.broadcast %206 : vector<1x512xi1> to vector<8x512xi1>
    %208 = vector.broadcast %cst_77 : f32 to vector<8x512xf32>
    %209 = arith.select %207, %186, %208 : vector<8x512xi1>, vector<8x512xf32>
    %c56 = arith.constant 56 : index
    %c0_78 = arith.constant 0 : index
    %210 = vector.load %arg6[%c56, %c0_78] : memref<80x512xf32, #tpu.memory_space<vmem>>, vector<8x512xf32>
    tpu.vector_store %arg6[%c56, %c0_78], %209 {strides = array<i32>} : memref<80x512xf32, #tpu.memory_space<vmem>>, vector<8x512xf32>,
    %c495_i32 = arith.constant 495 : i32
    %211 = tpu.dynamic_rotate %1 by %c495_i32 dim 1 : vector<8x512xf32>, i32 -> vector<8x512xf32>
    %c17_i32_79 = arith.constant 17 : i32
    %212 = vector.broadcast %c17_i32_79 : i32 to vector<1x512xi32>
    %213 = arith.addi %18, %212 : vector<1x512xi32>
    %c0_i32_80 = arith.constant 0 : i32
    %214 = vector.broadcast %c0_i32_80 : i32 to vector<1x512xi32>
    %215 = arith.cmpi sge, %213, %214 : vector<1x512xi32>
    %c17_i32_81 = arith.constant 17 : i32
    %216 = vector.broadcast %c17_i32_81 : i32 to vector<1x512xi32>
    %217 = arith.addi %18, %216 : vector<1x512xi32>
    %c256_i32_82 = arith.constant 256 : i32
    %218 = vector.broadcast %c256_i32_82 : i32 to vector<1x512xi32>
    %219 = arith.cmpi slt, %217, %218 : vector<1x512xi32>
    %220 = arith.andi %215, %219 : vector<1x512xi1>
    %c1_i32_83 = arith.constant 1 : i32
    %221 = vector.broadcast %c1_i32_83 : i32 to vector<1x512xi32>
    %222 = arith.addi %34, %221 : vector<1x512xi32>
    %c0_i32_84 = arith.constant 0 : i32
    %223 = vector.broadcast %c0_i32_84 : i32 to vector<1x512xi32>
    %224 = arith.cmpi sge, %222, %223 : vector<1x512xi32>
    %225 = arith.andi %220, %224 : vector<1x512xi1>
    %c1_i32_85 = arith.constant 1 : i32
    %226 = vector.broadcast %c1_i32_85 : i32 to vector<1x512xi32>
    %227 = arith.addi %34, %226 : vector<1x512xi32>
    %c16_i32_86 = arith.constant 16 : i32
    %228 = vector.broadcast %c16_i32_86 : i32 to vector<1x512xi32>
    %229 = arith.cmpi slt, %227, %228 : vector<1x512xi32>
    %230 = arith.andi %225, %229 : vector<1x512xi1>
    %cst_87 = arith.constant 0.000000e+00 : f32
    %231 = vector.shape_cast %230 : vector<1x512xi1> to vector<1x512xi1>
    %232 = vector.broadcast %231 : vector<1x512xi1> to vector<8x512xi1>
    %233 = vector.broadcast %cst_87 : f32 to vector<8x512xf32>
    %234 = arith.select %232, %211, %233 : vector<8x512xi1>, vector<8x512xf32>
    %c64 = arith.constant 64 : index
    %c0_88 = arith.constant 0 : index
    %235 = vector.load %arg6[%c64, %c0_88] : memref<80x512xf32, #tpu.memory_space<vmem>>, vector<8x512xf32>
    tpu.vector_store %arg6[%c64, %c0_88], %234 {strides = array<i32>} : memref<80x512xf32, #tpu.memory_space<vmem>>, vector<8x512xf32>,
    %236 = tpu.iota {dimensions = array<i32: 0>} : vector<8x512xi32>
    %c0_i32_89 = arith.constant 0 : i32
    %237 = vector.broadcast %c0_i32_89 : i32 to vector<8x512xi32>
    %238 = arith.cmpi eq, %236, %237 : vector<8x512xi32>
    %cst_90 = arith.constant 1.000000e+00 : f32
    %cst_91 = arith.constant 0.000000e+00 : f32
    %239 = vector.broadcast %cst_90 : f32 to vector<8x512xf32>
    %240 = vector.broadcast %cst_91 : f32 to vector<8x512xf32>
    %241 = arith.select %238, %239, %240 : vector<8x512xi1>, vector<8x512xf32>
    %c72 = arith.constant 72 : index
    %c0_92 = arith.constant 0 : index
    %242 = vector.load %arg6[%c72, %c0_92] : memref<80x512xf32, #tpu.memory_space<vmem>>, vector<8x512xf32>
    tpu.vector_store %arg6[%c72, %c0_92], %241 {strides = array<i32>} : memref<80x512xf32, #tpu.memory_space<vmem>>, vector<8x512xf32>,
    %c0_93 = arith.constant 0 : index
    %c0_94 = arith.constant 0 : index
    %243 = vector.load %arg3[%c0_93, %c0_94] : memref<48x128xf32, #tpu.memory_space<vmem>>, vector<24x80xf32>
    %c24_95 = arith.constant 24 : index
    %c0_96 = arith.constant 0 : index
    %244 = vector.load %arg3[%c24_95, %c0_96] : memref<48x128xf32, #tpu.memory_space<vmem>>, vector<8x24xf32>
    %c32_97 = arith.constant 32 : index
    %c0_98 = arith.constant 0 : index
    %245 = vector.load %arg3[%c32_97, %c0_98] : memref<48x128xf32, #tpu.memory_space<vmem>>, vector<16x32xf32>
    %c0_99 = arith.constant 0 : index
    %c0_100 = arith.constant 0 : index
    %246 = vector.load %arg6[%c0_99, %c0_100] : memref<80x512xf32, #tpu.memory_space<vmem>>, vector<80x512xf32>
    %cst_101 = arith.constant dense<0.000000e+00> : vector<24x512xf32>
    %247 = tpu.matmul %243, %246, %cst_101 {dimension_numbers = #tpu.dot_dimension_numbers<[1], [0], [0], [1], [0, 0, 1, 1], [], []>} : vector<24x80xf32>, vector<80x512xf32>, vector<24x512xf32> -> vector<24x512xf32>
    %cst_102 = arith.constant 0.000000e+00 : f32
    %248 = vector.broadcast %cst_102 : f32 to vector<24x512xf32>
    %249 = arith.maximumf %247, %248 : vector<24x512xf32>
    %cst_103 = arith.constant dense<0.000000e+00> : vector<8x512xf32>
    %250 = tpu.matmul %244, %249, %cst_103 {dimension_numbers = #tpu.dot_dimension_numbers<[1], [0], [0], [1], [0, 0, 1, 1], [], []>} : vector<8x24xf32>, vector<24x512xf32>, vector<8x512xf32> -> vector<8x512xf32>
    %251 = vector.extract_strided_slice %250 {offsets = [0, 0], sizes = [8, 256], strides = [1, 1]} : vector<8x512xf32> to vector<8x256xf32>
    %252 = vector.extract_strided_slice %250 {offsets = [0, 256], sizes = [8, 256], strides = [1, 1]} : vector<8x512xf32> to vector<8x256xf32>
    %253 = tpu.concatenate %251, %252 in 0 : vector<8x256xf32>, vector<8x256xf32> -> vector<16x256xf32>
    %c0_104 = arith.constant 0 : index
    %c0_105 = arith.constant 0 : index
    %c0_106 = arith.constant 0 : index
    %254 = vector.load %arg4[%c0_104, %c0_105, %c0_106] : memref<1x16x256xf32, #tpu.memory_space<vmem>>, vector<1x16x256xf32>
    %255 = vector.shape_cast %254 : vector<1x16x256xf32> to vector<16x256xf32>
    %256 = vector.shape_cast %253 : vector<16x256xf32> to vector<1x16x256xf32>
    tpu.vector_store %arg4[%c0_104, %c0_105, %c0_106], %256 {strides = array<i32>} : memref<1x16x256xf32, #tpu.memory_space<vmem>>, vector<1x16x256xf32>,
    %c0_107 = arith.constant 0 : index
    %c0_108 = arith.constant 0 : index
    %c0_109 = arith.constant 0 : index
    %257 = vector.load %arg2[%c0_107, %c0_108, %c0_109] : memref<1x16x256xf32, #tpu.memory_space<vmem>>, vector<1x16x256xf32>
    %258 = vector.shape_cast %257 : vector<1x16x256xf32> to vector<16x256xf32>
    %259 = tpu.concatenate %253, %258 in 0 : vector<16x256xf32>, vector<16x256xf32> -> vector<32x256xf32>
    %cst_110 = arith.constant dense<0.000000e+00> : vector<16x256xf32>
    %260 = tpu.matmul %245, %259, %cst_110 {dimension_numbers = #tpu.dot_dimension_numbers<[1], [0], [0], [1], [0, 0, 1, 1], [], []>} : vector<16x32xf32>, vector<32x256xf32>, vector<16x256xf32> -> vector<16x256xf32>
    %c0_111 = arith.constant 0 : index
    %c0_112 = arith.constant 0 : index
    %c0_113 = arith.constant 0 : index
    %261 = vector.load %arg5[%c0_111, %c0_112, %c0_113] : memref<1x16x256xf32, #tpu.memory_space<vmem>>, vector<1x16x256xf32>
    %262 = vector.shape_cast %261 : vector<1x16x256xf32> to vector<16x256xf32>
    %263 = vector.shape_cast %260 : vector<16x256xf32> to vector<1x16x256xf32>
    tpu.vector_store %arg5[%c0_111, %c0_112, %c0_113], %263 {strides = array<i32>} : memref<1x16x256xf32, #tpu.memory_space<vmem>>, vector<1x16x256xf32>,
    return
  }
  func.func @transform_0(%arg0: i32) -> (i32, i32, i32) {
    %c0_i32 = arith.constant 0 : i32
    %c0_i32_0 = arith.constant 0 : i32
    %c0_i32_1 = arith.constant 0 : i32
    return %arg0, %c0_i32, %c0_i32_0 : i32, i32, i32
  }
  func.func @transform_1(%arg0: i32) -> (i32, i32, i32) {
    %c0_i32 = arith.constant 0 : i32
    %c0_i32_0 = arith.constant 0 : i32
    %c0_i32_1 = arith.constant 0 : i32
    return %arg0, %c0_i32, %c0_i32_0 : i32, i32, i32
  }
  func.func @transform_2(%arg0: i32) -> (i32, i32) {
    %c0_i32 = arith.constant 0 : i32
    %c0_i32_0 = arith.constant 0 : i32
    %c0_i32_1 = arith.constant 0 : i32
    return %c0_i32, %c0_i32_0 : i32, i32
  }
  func.func @transform_3(%arg0: i32) -> (i32, i32, i32) {
    %c0_i32 = arith.constant 0 : i32
    %c0_i32_0 = arith.constant 0 : i32
    %c0_i32_1 = arith.constant 0 : i32
    return %arg0, %c0_i32, %c0_i32_0 : i32, i32, i32
  }
  func.func @transform_4(%arg0: i32) -> (i32, i32, i32) {
    %c0_i32 = arith.constant 0 : i32
    %c0_i32_0 = arith.constant 0 : i32
    %c0_i32_1 = arith.constant 0 : i32
    return %arg0, %c0_i32, %c0_i32_0 : i32, i32, i32
  }
}

</mosaic_0001>

<bundles_post_ra>
// kernel: deeplab_multiview_forward.1
= control target key start
LH: loop header
LB: loop body
LE: loop exit
PB: predicated region body
PF: predicated region fallthrough
CT: control target
= control target key end

     0   :  { %s1645_s15 = smov 0   ;;  %s2042_s0 = inlined_call_operand.vmem [shape: f32[2,8,512], index: 0, kind: input, shape index: {}]   ;;  %s2043_s1 = inlined_call_operand.vmem [shape: f32[2,16,256], index: 1, kind: input, shape index: {}]   ;;  %s2044_s2 = inlined_call_operand.vmem [shape: f32[48,128], index: 2, kind: input, shape index: {}]   ;;  %s2045_s3 = inlined_call_operand.vmem [shape: f32[2,16,256], index: 3, kind: output, shape index: {0}]   ;;  %s2046_s4 = inlined_call_operand.vmem [shape: f32[2,16,256], index: 4, kind: output, shape index: {1}]  }
   0x1 LB: > { %s1380_s16 = sadd.s32 4294967295, %s1607_s15   ;;  %p1384_p0 = scmp.ge.s32.totalorder %s1607_s15, 1  ;;  %s1607_s15 = sphi %s1645_s15, %s15_s15  }
   0x2   : > { %p175_p1 = scmp.lt.s32.totalorder %s1607_s15, 3 }
   0x4   : > { %p176_p2 = pnand %p1384_p0, %p175_p1 }
   0x5   : > { %p211_p3 = scmp.lt.s32.totalorder (!%p176_p2), %s1380_s16, 1  ;;  %s1609_s21 = smov (!%p176_p2), 17   ;;  %v1616_v8 = vmov (!%p176_p2), 0.0   ;;  %v235_v9 = vlaneseq (!%p176_p2)  ;;  %vm2050_vm13 = vmmov (!%p176_p2), 1  }
   0x6   : > { %179 = sbr.rel (%p176_p2) target bundleno = 846 (0x34e), region = 32  ;;  %s1610_s22 = smov (!%p176_p2), 16   ;;  %924 = vmatprep.mubr.f32.mxu0 (!%p176_p2), %v1616_v8  ;;  %1007 = vmatprep.mubr.f32.mxu1 (!%p176_p2), %v1616_v8 }
   0x7   : > { %s1611_s23 = smov (!%p176_p2), 1   ;;  %s1612_s24 = smov (!%p176_p2), 15   ;;  %v1684_v10 = vand.u32 (!%p176_p2), 127, %v235_v9 }
   0x8   : > { %s1613_s25 = smov (!%p176_p2), 127   ;;  %s1614_s26 = smov (!%p176_p2), 112  }
   0x9   : > { %s1615_s27 = smov (!%p176_p2), 113   ;;  %s1617_s28 = smov (!%p176_p2), 111   ;;  %v237_v11 = vadd.s32 (!%p176_p2), 128, %v1684_v10  ;;  %v239_v12 = vadd.s32 (!%p176_p2), 384, %v1684_v10  ;;  %v244_v13 = vand.u32 (!%p176_p2), 255, %v1684_v10  ;;  %v292_v14 = vand.u32 (!%p176_p2), 15, %v1684_v10 }
   0xa   : > { %v238_v16 = vadd.s32 (!%p176_p2), 256, %v1684_v10  ;;  %vm344_vm0 = vcmp.lt.s32.totalorder (!%p176_p2), %v1684_v10, 17  ;;  %vm409_vm3 = vcmp.lt.s32.totalorder (!%p176_p2), %v1684_v10, 16 }
   0xb   : > { %v299_v15 = vand.u32 (!%p176_p2), 15, %v237_v11  ;;  %v313_v17 = vand.u32 (!%p176_p2), 15, %v239_v12  ;;  %v349_v18 = vadd.s32 (!%p176_p2), 4294967279, %v244_v13  ;;  %v1691_v19 = vadd.s32 (!%p176_p2), 4294967295, %v292_v14 }
   0xc   : > { %v258_v21 = vand.u32 (!%p176_p2), 255, %v238_v16  ;;  %v306_v22 = vand.u32 (!%p176_p2), 15, %v238_v16  ;;  %v414_v24 = vadd.s32 (!%p176_p2), 4294967280, %v244_v13  ;;  %v475_v26 = vadd.s32 (!%p176_p2), 4294967281, %v244_v13 }
   0xd   : > { %s2120_s16 = smov (!%p211_p3, %s1380_s16), 1  ;;  %v1693_v20 = vadd.s32 4294967295, %v299_v15  ;;  %v1696_v23 = vadd.s32 4294967295, %v313_v17  ;;  %v1698_v25 = vadd.s32 1, %v299_v15  ;;  %vm353_vm1 = vcmp.ge.s32.totalorder %v349_v18, 0 }
   0xe   : > { %s1653_s17 = sshll.u32 %s2120_s16, 5  ;;  %vm2048_vm2 = vcmp.ge.s32.totalorder %v1691_v19, 0  ;;  %v1701_v27 = vadd.s32 1, %v292_v14  ;;  %v1703_v28 = vand.u32 255, %v237_v11  ;;  %v540_v29 = vadd.s32 4294967295, %v244_v13 }
   0xf   : > { %s215_s20 = scalar_lea.vmem %s2042_s0, %s1653_s17  ;;  %vm2047_vm4 = vcmp.ge.s32.totalorder %v1693_v20, 0  ;;  %v1707_v30 = vand.u32 255, %v239_v12  ;;  %v351_v31 = vadd.s32 4294967279, %v258_v21  ;;  %v1709_v32 = vadd.s32 4294967295, %v306_v22  ;;  %vm1714_vm6 = vmand %vm353_vm1, %vm2048_vm2  ;;  %s225_s13 = scalar_lea.vmem %s2045_s3, %s1653_s17 }
  0x10   : > { %v1659_v0 = vld [vmem:[%s215_s20 + $0x10] sm:$0xff]  ;;  %v1661_v1 = vld [vmem:[%s215_s20 + $0x18] sm:$0xff]  ;;  %v1663_v2 = vld [vmem:[%s215_s20] sm:$0xff]  ;;  %vm418_vm7 = vcmp.ge.s32.totalorder %v414_v24, 0  ;;  %v416_v35 = vadd.s32 4294967280, %v258_v21  ;;  %v1718_v36 = vadd.s32 1, %v313_v17  ;;  %s220_s18 = scalar_lea.vmem %s2043_s1, %s1653_s17 }
  0x11   : > { %v1546_v3 = vpack.i.bf16 %v1659_v0, %v1661_v1  ;;  %v1667_v4 = vld [vmem:[%s215_s20 + $0x8] sm:$0xff]  ;;  %v1581_v6 = vpack.i.bf16 %v1661_v1, %v1663_v2  ;;  %v1720_v37 = vadd.s32 4294967281, %v258_v21  ;;  %vm2053_vm9 = vcmp.ge.s32.totalorder %v1696_v23, 0  ;;  %vm1729_vm14 = vmpackc.low %vm2050_vm13, %vm2047_vm4 }
  0x12   : > { %v1536_v5 = vpack.i.bf16 %v1667_v4, %v1663_v2  ;;  %v1576_v7 = vpack.i.bf16 %v1659_v0, %v1667_v4  ;;  %vm479_vm11 = vcmp.ge.s32.totalorder %v475_v26, 0  ;;  %vm2049_vm12 = vcmp.lt.s32.totalorder %v1701_v27, 16  ;;  %vm1738_vm1 = vmpackc.low %vm418_vm7, %vm1714_vm6 }
  0x13   : > { %1547 = vrot.lane.b32.xlu1 %v1546_v3, %s1609_s21  ;;  %v1733_v42 = vadd.s32 1, %v306_v22  ;;  %vm355_vm8 = vcmp.ge.s32.totalorder %v351_v31, 0  ;;  %vm2052_vm5 = vcmp.ge.s32.totalorder %v1709_v32, 0  ;;  %vm1746_vm4 = vmpackc.low %vm2050_vm13, %vm2053_vm9  ;;  %vm420_vm10 = vcmp.ge.s32.totalorder %v416_v35, 0 }
  0x14   : > { %1537 = vrot.lane.b32.xlu0 %v1536_v5, %s1609_s21  ;;  %vm2055_vm15 = vcmp.lt.s32.totalorder %v1718_v36, 16  ;;  %v542_v48 = vadd.s32 4294967295, %v258_v21  ;;  %vm1755_vm6 = vmand %vm479_vm11, %vm2049_vm12  ;;  %v598_v53 = vadd.s32 1, %v1703_v28  ;;  %v600_v54 = vadd.s32 1, %v1707_v30 }
  0x15   : > { %vm1766_vm7 = vmand %vm355_vm8, %vm2052_vm5  ;;  %vm2054_vm11 = vcmp.lt.s32.totalorder %v1733_v42, 16  ;;  %vm2068_vm12 = vcmp.ge.s32.totalorder %v1691_v19, 0  ;;  %vm2069_vm8 = vcmp.ge.s32.totalorder %v540_v29, 0  ;;  %vm2073_vm5 = vcmp.ge.s32.totalorder %v1693_v20, 0 }
  0x16   : > { %vm1782_vm13 = vmand %vm2069_vm8, %vm2068_vm12  ;;  %vm2076_vm8 = vcmp.lt.s32.totalorder %v1684_v10, 1  ;;  %v757_v63 = vadd.s32 17, %v1703_v28 }
  0x17   : > { %1552 = vrot.lane.b32.xlu1 %v1546_v3, %s1610_s22  ;;  %vm1475_vm12 = vmpackc.low %vm420_vm10, %vm1766_vm7  ;;  %vm2079_vm7 = vcmp.lt.s32.totalorder %v1684_v10, 15 }
  0x18   : > { %1542 = vrot.lane.b32.xlu0 %v1536_v5, %s1610_s22  ;;  %vm1817_vm10 = vmpackc.low %vm2053_vm9, %vm2055_vm15 }
  0x1b   : > { %1562 = vrot.lane.b32.xlu1 %v1536_v5, %s1611_s23 }
  0x1c   : > { %1557 = vrot.lane.b32.xlu0 %v1536_v5, %s1612_s24 }
  0x1f   : > { %1572 = vrot.lane.b32.xlu1 %v1546_v3, %s1611_s23 }
  0x20   : > { %1567 = vrot.lane.b32.xlu0 %v1546_v3, %s1612_s24 }
  0x23   : > { %1582 = vrot.lane.b32.xlu1 %v1581_v6, %s1613_s25 }
  0x24   : > { %1577 = vrot.lane.b32.xlu0 %v1576_v7, %s1613_s25  ;;  %s230_s25 = scalar_lea.vmem %s2046_s4, %s1653_s17 }
  0x27   : > { %1592 = vrot.lane.b32.xlu1 %v1576_v7, %s1614_s26 }
  0x28   : > { %1587 = vrot.lane.b32.xlu0 %v1576_v7, %s1615_s27 }
  0x2b   : > { %690 = vrot.lane.b32.xlu1 %v1663_v2, %s1614_s26 }
  0x2c   : > { %637 = vrot.lane.b32.xlu0 %v1663_v2, %s1615_s27 }
  0x2f   : > { %743 = vrot.lane.b32.xlu1 %v1663_v2, %s1617_s28 }
  0x30   : > { %1597 = vrot.lane.b32.xlu0 %v1576_v7, %s1617_s28 }
  0x33   : > { %696 = vrot.lane.b32.xlu1 %v1661_v1, %s1614_s26 }
  0x34   : > { %643 = vrot.lane.b32.xlu0 %v1661_v1, %s1615_s27 }
  0x38   : > { %749 = vrot.lane.b32.xlu0 %v1661_v1, %s1617_s28 }
  0x85   : > { %v1548_v33 = vpop.permute.xlu1 %1547 }
  0x86   : > { %v1538_v38 = vpop.permute.xlu0 %1537  ;;  %v1550_v39 = vunpack.i.h.bf16 %v1548_v33  ;;  %v1549_v40 = vunpack.i.l.bf16 %v1548_v33 }
  0x87   : > { %v1540_v43 = vunpack.i.h.bf16 %v1538_v38  ;;  %v1539_v44 = vunpack.i.l.bf16 %v1538_v38 }
  0x88   : > { %v345_v57 = vsel %vm344_vm0, %v1550_v39, %v1549_v40 }
  0x89   : > { %v1553_v46 = vpop.permute.xlu1 %1552  ;;  %v347_v59 = vsel %vm344_vm0, %v1539_v44, %v1540_v43  ;;  %v348_v61 = vsel %vm344_vm0, %v1549_v40, %v1539_v44  ;;  %v346_v62 = vsel %vm344_vm0, %v1540_v43, %v1550_v39  ;;  %vm2072_vm0 = vcmp.lt.s32.totalorder %v1698_v25, 16 }
  0x8a   : > { %v1555_v49 = vunpack.i.h.bf16 %v1553_v46  ;;  %v1554_v50 = vunpack.i.l.bf16 %v1553_v46  ;;  %v1543_v51 = vpop.permute.xlu0 %1542  ;;  %vm1796_vm2 = vmpackc.low %vm2073_vm5, %vm2072_vm0  ;;  %vm546_vm5 = vcmp.ge.s32.totalorder %v542_v48, 0  ;;  %v651_v44 = vadd.s32 15, %v1703_v28 }
  0x8b   : > { %v1545_v55 = vunpack.i.h.bf16 %v1543_v51  ;;  %v1544_v56 = vunpack.i.l.bf16 %v1543_v51 }
  0x8c   : > { %v410_v60 = vsel %vm409_vm3, %v1555_v49, %v1554_v50 }
  0x8d   : > { %v1563_v3 = vpop.permute.xlu1 %1562  ;;  %v412_v5 = vsel %vm409_vm3, %v1544_v56, %v1545_v55  ;;  %v1471_v6 = vpack.c.bf16 %v410_v60, %v345_v57  ;;  %v413_v7 = vsel %vm409_vm3, %v1554_v50, %v1544_v56  ;;  %v411_v11 = vsel %vm409_vm3, %v1545_v55, %v1555_v49  ;;  %vm1451_vm3 = vmpackc.low %vm1782_vm13, %vm1755_vm6 }
  0x8e   : > { %v1565_v13 = vunpack.i.h.bf16 %v1563_v3  ;;  %v1564_v14 = vunpack.i.l.bf16 %v1563_v3  ;;  %v1558_v15 = vpop.permute.xlu0 %1557  ;;  %v1441_v16 = vpack.c.bf16 %v412_v5, %v347_v59  ;;  %v1444_v17 = vpack.c.bf16 %v413_v7, %v348_v61 }
  0x8f   : > { %v1560_v18 = vunpack.i.h.bf16 %v1558_v15  ;;  %v1559_v21 = vunpack.i.l.bf16 %v1558_v15  ;;  %1473 = vmatprep.subr.msk.bf16.mxu1 %vm1746_vm4, %v1471_v6  ;;  %v1474_v22 = vpack.c.bf16 %v411_v11, %v346_v62  ;;  %vm606_vm4 = vcmp.lt.s32.totalorder %v598_v53, 256 }
  0x90   : > { %v538_v24 = vsel %vm2076_vm8, %v1564_v14, %v1565_v13  ;;  %1443 = vmatprep.subr.msk.bf16.mxu0 %vm1729_vm14, %v1441_v16  ;;  %vm2080_vm14 = vcmp.ge.s32.totalorder %v1720_v37, 0  ;;  %vm608_vm8 = vcmp.lt.s32.totalorder %v600_v54, 256  ;;  %v704_v49 = vadd.s32 16, %v1703_v28 }
  0x91   : > { %v473_v29 = vsel %vm2079_vm7, %v1559_v21, %v1560_v18  ;;  %1446 = vmatpush1.bf16.msk.msra.mxu0 %vm1738_vm1, %v1444_v17  ;;  %1476 = vmatpush1.bf16.msk.msra.mxu1 %vm1475_vm12, %v1474_v22  ;;  %v1573_v31 = vpop.permute.xlu1 %1572  ;;  %vm1829_vm0 = vmand %vm2080_vm14, %vm2054_vm11  ;;  %vm2083_vm7 = vcmp.ge.s32.totalorder %v1709_v32, 0  ;;  %vm2086_vm1 = vcmp.lt.s32.totalorder %v1698_v25, 16  ;;  %vm2089_vm14 = vcmp.lt.s32.totalorder %v1684_v10, 1 }
  0x92   : > { %v1447_v34 = vpack.c.bf16 %v538_v24, %v473_v29  ;;  %v1575_v35 = vunpack.i.h.bf16 %v1573_v31  ;;  %v1574_v38 = vunpack.i.l.bf16 %v1573_v31  ;;  %v1568_v39 = vpop.permute.xlu0 %1567  ;;  %vm1836_vm9 = vmand %vm546_vm5, %vm2083_vm7  ;;  %vm2094_vm7 = vcmp.lt.s32.totalorder %v1684_v10, 15 }
  0x93   : > { %v1570_v41 = vunpack.i.h.bf16 %v1568_v39  ;;  %v1569_v43 = vunpack.i.l.bf16 %v1568_v39  ;;  %vm1842_vm12 = vmand %vm606_vm4, %vm2086_vm1  ;;  %vm2105_vm13 = vcmp.lt.s32.totalorder %v1733_v42, 16 }
  0x94   : > { %v536_v45 = vsel %vm2089_vm14, %v1575_v35, %v1574_v38  ;;  %vm2090_vm11 = vmmov %vm2089_vm14  ;;  %1449 = vmatprep.subr.msk.bf16.mxu0 %vm1796_vm2, %v1447_v34  ;;  %vm592_vm14 = vcmp.lt.s32.totalorder %v1684_v10, 127  ;;  %v706_v34 = vadd.s32 16, %v1707_v30 }
  0x95   : > { %v537_v46 = vsel %vm2090_vm11, %v1565_v13, %v1575_v35  ;;  %vm2091_vm5 = vmmov %vm2090_vm11  ;;  %v471_v50 = vsel %vm2094_vm7, %v1570_v41, %v1569_v43  ;;  %v1583_v54 = vpop.permute.xlu1 %1582 }
  0x96   : > { %v539_v47 = vsel %vm2091_vm5, %v1574_v38, %v1564_v14  ;;  %vm1857_vm4 = vmand %vm608_vm8, %vm2055_vm15  ;;  %v1477_v56 = vpack.c.bf16 %v536_v45, %v471_v50  ;;  %v1585_v58 = vunpack.i.h.bf16 %v1583_v54  ;;  %v1578_v59 = vpop.permute.xlu0 %1577  ;;  %vm2097_vm8 = vmmov 1  }
  0x97   : > { %vm2095_vm1 = vmmov %vm2094_vm7  ;;  %v1584_v61 = vunpack.i.l.bf16 %v1583_v54  ;;  %v1580_v62 = vunpack.i.h.bf16 %v1578_v59  ;;  %v1579_v3 = vunpack.i.l.bf16 %v1578_v59  ;;  %vm645_vm15 = vcmp.lt.s32.totalorder %v1684_v10, 113 }
  0x98   : > { %v472_v51 = vsel %vm2095_vm1, %v1560_v18, %v1570_v41  ;;  %vm2096_vm11 = vmmov %vm2095_vm1  ;;  %1479 = vmatprep.subr.msk.bf16.mxu1 %vm1817_vm10, %v1477_v56  ;;  %vm712_vm1 = vcmp.lt.s32.totalorder %v704_v49, 256  ;;  %vm2107_vm10 = vcmp.lt.s32.totalorder %v651_v44, 256 }
  0x99   : > { %v474_v53 = vsel %vm2096_vm11, %v1569_v43, %v1559_v21  ;;  %vm1481_vm2 = vmpackc.low %vm1836_vm9, %vm1829_vm0  ;;  %v1480_v57 = vpack.c.bf16 %v537_v46, %v472_v51  ;;  %v596_v52 = vsel %vm592_vm14, %v1585_v58, %v1584_v61  ;;  %v593_v7 = vsel %vm592_vm14, %v1580_v62, %v1585_v58  ;;  %v1593_v13 = vpop.permute.xlu1 %1592 }
  0x9a   : > { %v1450_v55 = vpack.c.bf16 %v539_v47, %v474_v53  ;;  %vm1876_vm5 = vmpackc.low %vm1842_vm12, %vm2097_vm8  ;;  %vm2102_vm12 = vcmp.lt.s32.totalorder %v1701_v27, 16  ;;  %v594_v11 = vsel %vm592_vm14, %v1579_v3, %v1580_v62  ;;  %v595_v12 = vsel %vm592_vm14, %v1584_v61, %v1579_v3  ;;  %v1588_v17 = vpop.permute.xlu0 %1587  ;;  %v804_v53 = vld [vmem:[%s2044_s2] sm:$0xff] }
  0x9b   : > { %vm1883_vm7 = vmpackc.low %vm1857_vm4, %vm2097_vm8  ;;  %vm698_vm4 = vcmp.lt.s32.totalorder %v1684_v10, 112  ;;  %1482 = vmatpush1.bf16.msk.msra.mxu1 %vm1481_vm2, %v1480_v57  ;;  %v1483_v28 = vpack.c.bf16 %v596_v52, %v1661_v1  ;;  %v1486_v14 = vpack.c.bf16 %v593_v7, %v1659_v0  ;;  %v1453_v15 = vpack.c.bf16 %v594_v11, %v1667_v4  ;;  %v805_v57 = vld [vmem:[%s2044_s2 + $0x8] sm:$0xff] }
  0x9c   : > { %1452 = vmatpush1.bf16.msk.msra.mxu0 %vm1451_vm3, %v1450_v55  ;;  %vm1897_vm11 = vmpackc.low %vm2102_vm12, %vm2097_vm8  ;;  %v1456_v16 = vpack.c.bf16 %v595_v12, %v1663_v2  ;;  %vm2106_vm3 = vcmp.ge.s32.totalorder %v1693_v20, 0  ;;  %v1595_v18 = vunpack.i.h.bf16 %v1593_v13  ;;  %v1594_v21 = vunpack.i.l.bf16 %v1593_v13 }
  0x9d   : > { %vm1487_vm6 = vmpackc.low %vm2105_vm13, %vm2097_vm8  ;;  %v1590_v22 = vunpack.i.h.bf16 %v1588_v17  ;;  %v1589_v24 = vunpack.i.l.bf16 %v1588_v17  ;;  %1455 = vmatprep.subr.msk.bf16.mxu0 %vm1876_vm5, %v1453_v15  ;;  %1485 = vmatprep.subr.msk.bf16.mxu1 %vm1883_vm7, %v1483_v28  ;;  %v653_v0 = vadd.s32 15, %v1707_v30  ;;  %v691_v1 = vpop.permute.xlu1 %690  ;;  %v797_v20 = vshrl.u32 %v235_v9, 7 }
  0x9e   : > { %vm667_vm14 = vmand %vm2107_vm10, %vm2106_vm3  ;;  %v700_v4 = vsel %vm698_vm4, %v1594_v21, %v1595_v18  ;;  %v701_v26 = vsel %vm698_vm4, %v691_v1, %v1594_v21  ;;  %v638_v29 = vpop.permute.xlu0 %637  ;;  %vm765_vm0 = vcmp.lt.s32.totalorder %v757_v63, 256  ;;  %vm2108_vm2 = vcmp.ge.s32.totalorder %v1691_v19, 0 }
  0x9f   : > { %1488 = vmatpush1.bf16.msk.msra.mxu1 %vm1487_vm6, %v1486_v14  ;;  %v647_v2 = vsel %vm645_vm15, %v1589_v24, %v1590_v22  ;;  %vm1460_vm9 = vmpackc.low %vm712_vm1, %vm667_vm14  ;;  %v648_v33 = vsel %vm645_vm15, %v638_v29, %v1589_v24  ;;  %vm661_vm7 = vcmp.lt.s32.totalorder %v653_v0, 256  ;;  %vm2109_vm1 = vcmp.lt.s32.totalorder %v1698_v25, 16  ;;  %v807_v24 = vld [vmem:[%s2044_s2 + $0x18] sm:$0xff] }
  0xa0   : > { %1458 = vmatpush1.bf16.msk.msra.mxu0 %vm1897_vm11, %v1456_v16  ;;  %v1459_v31 = vpack.c.bf16 %v700_v4, %v647_v2  ;;  %vm1463_vm5 = vmpackc.low %vm2097_vm8, %vm2108_vm2  ;;  %v1462_v35 = vpack.c.bf16 %v701_v26, %v648_v33  ;;  %vm798_vm11 = vcmp.eq.s32.totalorder %v797_v20, 0  ;;  %v759_v9 = vadd.s32 17, %v1707_v30  ;;  %v1191_v33 = vld [vmem:[%s220_s18 + $0x18] sm:$0xff] }
  0xa1   : > { %v744_v38 = vpop.permute.xlu1 %743  ;;  %vm777_vm12 = vmand %vm765_vm0, %vm2109_vm1  ;;  %vm751_vm13 = vcmp.lt.s32.totalorder %v1684_v10, 111  ;;  %vm2110_vm6 = vcmp.ge.s32.totalorder %v1696_v23, 0  ;;  %vm714_vm10 = vcmp.lt.s32.totalorder %v706_v34, 256  ;;  %v1619_v23 = vmov 1.0   ;;  %v806_v10 = vld [vmem:[%s2044_s2 + $0x10] sm:$0xff] }
  0xa2   : > { %1461 = vmatprep.subr.msk.bf16.mxu0 %vm1460_vm9, %v1459_v31  ;;  %v1598_v39 = vpop.permute.xlu0 %1597  ;;  %vm669_vm3 = vmand %vm661_vm7, %vm2110_vm6  ;;  %vm2113_vm9 = vcmp.lt.s32.totalorder %v1701_v27, 16  ;;  %vm767_vm2 = vcmp.lt.s32.totalorder %v759_v9, 256  ;;  %vm2116_vm7 = vcmp.ge.s32.totalorder %v1709_v32, 0  ;;  %vm2118_vm6 = vcmp.lt.s32.totalorder %v1733_v42, 16  ;;  %v1189_v31 = vld [vmem:[%s220_s18 + $0x8] sm:$0xff] }
  0xa3   : > { %v1600_v40 = vunpack.i.h.bf16 %v1598_v39  ;;  %v1599_v19 = vunpack.i.l.bf16 %v1598_v39  ;;  %vm1955_vm14 = vmpackc.low %vm798_vm11, %vm777_vm12  ;;  %vm2117_vm12 = vcmp.lt.s32.totalorder %v1718_v36, 16  ;;  %v1513_v39 = vpack.c.bf16 %v1191_v33, %v1189_v31 }
  0xa4   : > { %1464 = vmatpush1.bf16.msk.msra.mxu0 %vm1463_vm5, %v1462_v35  ;;  %vm1966_vm0 = vmpackc.low %vm798_vm11, %vm2113_vm9 }
  0xa5   : > { %v753_v25 = vsel %vm751_vm13, %v1599_v19, %v1600_v40  ;;  %v754_v30 = vsel %vm751_vm13, %v744_v38, %v1599_v19  ;;  %v697_v43 = vpop.permute.xlu1 %696  ;;  %vm1490_vm5 = vmpackc.low %vm714_vm10, %vm669_vm3  ;;  %v1190_v19 = vld [vmem:[%s220_s18 + $0x10] sm:$0xff] }
  0xa6   : > { %v1465_v44 = vpack.c.bf16 %v1619_v23, %v753_v25  ;;  %v1468_v45 = vpack.c.bf16 %v1619_v23, %v754_v30  ;;  %v699_v46 = vsel %vm698_vm4, %v1595_v18, %v697_v43  ;;  %v702_v47 = vsel %vm698_vm4, %v697_v43, %v691_v1  ;;  %v644_v48 = vpop.permute.xlu0 %643  ;;  %vm1493_vm1 = vmpackc.low %vm2097_vm8, %vm2116_vm7  ;;  %v808_v25 = vld [vmem:[%s2044_s2 + $0x20] sm:$0xff]  ;;  %v809_v30 = vld [vmem:[%s2044_s2 + $0x28] sm:$0xff] }
  0xa7   : > { %v646_v27 = vsel %vm645_vm15, %v1590_v22, %v644_v48  ;;  %v649_v49 = vsel %vm645_vm15, %v644_v48, %v638_v29  ;;  %vm779_vm4 = vmand %vm767_vm2, %vm2117_vm12  ;;  %vm850_vm15 = vcmask 654336  }
  0xa8   : > { %v1489_v50 = vpack.c.bf16 %v702_v47, %v649_v49  ;;  %v1492_v51 = vpack.c.bf16 %v699_v46, %v646_v27  ;;  %1467 = vmatprep.subr.msk.bf16.mxu0 %vm1955_vm14, %v1465_v44  ;;  %vm1496_vm8 = vmpackc.low %vm798_vm11, %vm779_vm4 }
  0xa9   : > { %1470 = vmatpush1.bf16.msk.msra.mxu0 %vm1966_vm0, %v1468_v45  ;;  %vm1499_vm3 = vmpackc.low %vm798_vm11, %vm2118_vm6  ;;  %vm1038_vm11 = vcmask 195584  }
  0xaa   : > { %v750_v54 = vpop.permute.xlu0 %749  ;;  %1491 = vmatprep.subr.msk.bf16.mxu1 %vm1490_vm5, %v1489_v50 }
  0xab   : > { %v752_v32 = vsel %vm751_vm13, %v1600_v40, %v750_v54  ;;  %v755_v55 = vsel %vm751_vm13, %v750_v54, %v744_v38  ;;  %1494 = vmatpush1.bf16.msk.msra.mxu1 %vm1493_vm1, %v1492_v51  ;;  %v1188_v40 = vld [vmem:[%s220_s18] sm:$0xff]  ;;  %vm1192_vm13 = vcmask 261120  }
  0xac   : > { %v1495_v36 = vpack.c.bf16 %v1619_v23, %v755_v55  ;;  %v1498_v56 = vpack.c.bf16 %v1619_v23, %v752_v32  ;;  %1393 = vmatmul.mubr.msk.f32.vlgmr.msra.gmra.mrb[0].mxu0 %vm850_vm15, %v804_v53  ;;  %v1515_v41 = vpack.c.bf16 %v1190_v19, %v1188_v40 }
  0xad   : > { %930 = vmatprep.mubr.f32.mxu0 %v1616_v8 }
  0xae   : > { %1497 = vmatprep.subr.msk.bf16.mxu1 %vm1496_vm8, %v1495_v36 }
  0xaf   : > { %1500 = vmatpush1.bf16.msk.msra.mxu1 %vm1499_vm3, %v1498_v56 }
  0xb0   : > { %1394 = vmatmul.mubr.msk.f32.gmra.mrb[2].mxu0 %vm850_vm15, %v805_v57 }
  0xb1   : > { %936 = vmatprep.mubr.f32.mxu0 %v1616_v8 }
  0xb2   : > { %1396 = vmatmul.mubr.msk.f32.vlgmr.msra.gmra.mrb[0].mxu1 %vm850_vm15, %v804_v53 }
  0xb3   : > { %1013 = vmatprep.mubr.f32.mxu1 %v1616_v8 }
  0xb4   : > { %1395 = vmatmul.mubr.msk.f32.gmra.mrb[4].mxu0 %vm850_vm15, %v806_v10 }
  0xb5   : > { %1263 = vmatprep.mubr.f32.mxu0 %v1616_v8 }
  0xb6   : > { %1397 = vmatmul.mubr.msk.f32.gmra.mrb[2].mxu1 %vm850_vm15, %v805_v57 }
  0xb7   : > { %1019 = vmatprep.mubr.f32.mxu1 %v1616_v8 }
  0xba   : > { %1398 = vmatmul.mubr.msk.f32.gmra.mrb[4].mxu1 %vm850_vm15, %v806_v10 }
  0xbb   : > { %1106 = vmatprep.mubr.f32.mxu1 %v1616_v8 }
 0x17f   : > { %v926_v42 = vpop.f32.mrb[0].mxu0 }
 0x180   : > { %v928_v58 = vpop.f32.mrb[1].mxu0  ;;  %v1026_v60 = vmax.f32 %v926_v42, 0.0 }
 0x181   : > { %v1027_v3 = vmax.f32 %v928_v58, 0.0 }
 0x183   : > { %v932_v59 = vpop.f32.mrb[2].mxu0 }
 0x184   : > { %v1030_v61 = vmax.f32 %v932_v59, 0.0  ;;  %v934_v62 = vpop.f32.mrb[3].mxu0 }
 0x185   : > { %v1031_v5 = vmax.f32 %v934_v62, 0.0  ;;  %v1009_v6 = vpop.f32.mrb[0].mxu1 }
 0x186   : > { %v1503_v63 = vpack.c.bf16 %v1030_v61, %v1026_v60  ;;  %v1011_v52 = vpop.f32.mrb[1].mxu1  ;;  %v1028_v14 = vmax.f32 %v1009_v6, 0.0 }
 0x187   : > { %v1501_v7 = vpack.c.bf16 %v1031_v5, %v1027_v3  ;;  %v938_v11 = vpop.f32.mrb[4].mxu0  ;;  %v1029_v17 = vmax.f32 %v1011_v52, 0.0 }
 0x188   : > { %v940_v12 = vpop.f32.mrb[5].mxu0  ;;  %v1034_v21 = vmax.f32 %v938_v11, 0.0 }
 0x189   : > { %v1015_v13 = vpop.f32.mrb[2].mxu1  ;;  %1502 = vmatprep.subr.bf16.mxu1 %v1501_v7  ;;  %v1035_v28 = vmax.f32 %v940_v12, 0.0 }
 0x18a   : > { %v1032_v15 = vmax.f32 %v1015_v13, 0.0  ;;  %v1017_v16 = vpop.f32.mrb[3].mxu1  ;;  %1504 = vmatpush1.bf16.msra.mxu1 %v1503_v63 }
 0x18b   : > { %v1033_v18 = vmax.f32 %v1017_v16, 0.0  ;;  %1046 = vmatprep.subr.mxu1 %v1035_v28 }
 0x18c   : > { %v1507_v22 = vpack.c.bf16 %v1032_v15, %v1028_v14 }
 0x18d   : > { %v1505_v0 = vpack.c.bf16 %v1033_v18, %v1029_v17  ;;  %v1021_v1 = vpop.f32.mrb[4].mxu1 }
 0x18e   : > { %1047 = vmatpush1.msra.mxu1 %v1034_v21  ;;  %v1023_v2 = vpop.f32.mrb[5].mxu1  ;;  %v1036_v20 = vmax.f32 %v1021_v1, 0.0 }
 0x18f   : > { %1506 = vmatprep.subr.bf16.mxu1 %v1505_v0  ;;  %v1037_v4 = vmax.f32 %v1023_v2, 0.0  ;;  %1399 = vmatmul.mubr.msk.f32.vlgmr.msra.gmra.mrb[6].mxu1 %vm1038_vm11, %v807_v24 }
 0x190   : > { %1508 = vmatpush1.bf16.msra.mxu1 %v1507_v22  ;;  %1177 = vmatprep.mubr.f32.mxu1 %v1616_v8 }
 0x191   : > { %1117 = vmatprep.subr.mxu1 %v1037_v4 }
 0x194   : > { %1118 = vmatpush1.msra.mxu1 %v1036_v20 }
 0x195   : > { %1400 = vmatmul.mubr.msk.f32.vlgmr.msra.gmra.mrb[8].mxu1 %vm1038_vm11, %v807_v24 }
 0x262   : > { %v1108_v26 = vpop.f32.mrb[6].mxu1 }
 0x263   : > { %1184 = vst [vmem:[%s225_s13] sm:$0xff] %v1108_v26  ;;  %v1110_v29 = vpop.f32.mrb[7].mxu1 }
 0x264   : > { %1185 = vst [vmem:[%s225_s13 + $0x8] sm:$0xff] %v1110_v29 }
 0x268   : > { %v1179_v34 = vpop.f32.mrb[8].mxu1 }
 0x269   : > { %1186 = vst [vmem:[%s225_s13 + $0x10] sm:$0xff] %v1179_v34  ;;  %v1511_v35 = vpack.c.bf16 %v1179_v34, %v1108_v26  ;;  %v1181_v38 = vpop.f32.mrb[9].mxu1 }
 0x26a   : > { %1187 = vst [vmem:[%s225_s13 + $0x18] sm:$0xff] %v1181_v38  ;;  %v1509_v9 = vpack.c.bf16 %v1181_v38, %v1110_v29 }
 0x26c   : > { %1510 = vmatprep.subr.bf16.mxu0 %v1509_v9 }
 0x26d   : > { %1512 = vmatpush1.bf16.msra.mxu0 %v1511_v35 }
 0x26e   : > { %1514 = vmatprep.subr.bf16.mxu0 %v1513_v39 }
 0x271   : > { %1516 = vmatpush1.bf16.msra.mxu0 %v1515_v41 }
 0x274   : > { %1401 = vmatmul.mubr.msk.f32.vlgmr.msra.gmra.mrb[6].mxu0 %vm1192_vm13, %v808_v25 }
 0x275   : > { %1269 = vmatprep.mubr.f32.mxu0 %v1616_v8 }
 0x278   : > { %1402 = vmatmul.mubr.msk.f32.gmra.mrb[8].mxu0 %vm1192_vm13, %v809_v30 }
 0x347   : > { %v1265_v43 = vpop.f32.mrb[6].mxu0 }
 0x348   : > { %1276 = vst [vmem:[%s230_s25] sm:$0xff] %v1265_v43  ;;  %v1267_v37 = vpop.f32.mrb[7].mxu0 }
 0x349   : > { %1277 = vst [vmem:[%s230_s25 + $0x8] sm:$0xff] %v1267_v37 }
 0x34b   : > { %v1271_v23 = vpop.f32.mrb[8].mxu0 }
 0x34c   : > { %1278 = vst [vmem:[%s230_s25 + $0x10] sm:$0xff] %v1271_v23  ;;  %v1273_v44 = vpop.f32.mrb[9].mxu0 }
 0x34d   : > { %1279 = vst [vmem:[%s230_s25 + $0x18] sm:$0xff] %v1273_v44 }
 0x34e PF: > { %s15_s15 = sadd.s32 1, %s1607_s15  }
 0x34f   : > { %p12_p4 = scmp.ge.s32.totalorder %s15_s15, 4  }
 0x351   :  { %14 = sbr.rel (!%p12_p4) target bundleno = 1 (0x1), region = 77 }

</bundles_post_ra>
